<compile_context>
chip_gen: v7x
topology: tpu7x:2x2x1
jax: 0.10.0
libtpu: 0.0.40
codegen_flags: <defaults>
</compile_context>

<pallas_src>
import functools
import math

import jax
import jax.numpy as jnp
from jax import lax
from jax.experimental import pallas as pl
from jax.experimental.pallas import tpu as pltpu

LANES = 128            # vreg lane width
SUBLANES = 8           # f32 sublanes per vreg
CHUNK_ROWS = 512       # rows per inner compute chunk (bounds live temporaries)
MAX_BLOCK_ROWS = 8192  # 16 MiB of double-buffered f32 input pipeline
_BCE_SAT = -math.log(1e-8)  # reference's +1e-8 guard saturates bce terms here


def _round_up(x, m):
    return ((x + m - 1) // m) * m


def _pow(x, gamma):
    # gamma is a static python float; exact integer power -> plain VPU muls.
    if float(gamma) == int(gamma) and int(gamma) >= 0:
        return x ** int(gamma)
    return jnp.power(x, jnp.float32(gamma))  # non-integer: extra EUP pushes


def _focal_terms(p, t, pos_weight, gamma):
    """focal / alpha for f32 inputs (alpha is hoisted to the wrapper)."""
    # softplus(p) = max(p,0) + log(1 + exp(-|p|))           (2 EUP pushes)
    # log(sigmoid(p)) = p - sp ; log(1 - sigmoid(p)) = -sp
    # Clamp each bce term at -log(1e-8) to match the reference's eps guard at
    # extreme logits (2 extra VPU mins, no EUP cost).
    sp = jnp.maximum(p, 0.0) + jnp.log(1.0 + jnp.exp(-jnp.abs(p)))
    bce = (jnp.float32(pos_weight) * t * jnp.minimum(sp - p, _BCE_SAT)
           + (1.0 - t) * jnp.minimum(sp, _BCE_SAT))
    pt = jnp.exp(-bce)                                      # 1 EUP push
    return _pow(1.0 - pt, gamma) * bce


def _focal_loss_kernel(p_ref, t_ref, out_ref, *, pos_weight, gamma,
                       chunk_rows, tail_valid_rows):
    block_rows = p_ref.shape[0]
    n_chunks = block_rows // chunk_rows

    def chunk_partial(off, masked):
        p = p_ref[pl.ds(off, chunk_rows), :].astype(jnp.float32)
        t = t_ref[pl.ds(off, chunk_rows), :].astype(jnp.float32)
        focal = _focal_terms(p, t, pos_weight, gamma)
        if masked:
            # Row-based OOB mask (lane remainder is handled in the wrapper).
            # Keep this a select: OOB rows hold garbage -> exp/log may be
            # NaN/Inf and must be discarded, not multiplied.
            rid = lax.broadcasted_iota(jnp.int32, focal.shape, 0) + off
            focal = jnp.where(rid < tail_valid_rows, focal, 0.0)
        # Fold chunk rows into 8 sublanes: layout-free retiling + VPU adds,
        # no cross-sublane XLU work.
        return focal.reshape(chunk_rows // SUBLANES, SUBLANES, LANES).sum(axis=0)

    def run(masked):
        def body(c, acc):
            off = pl.multiple_of(c * chunk_rows, chunk_rows)
            return acc + chunk_partial(off, masked)
        return lax.fori_loop(0, n_chunks, body,
                             jnp.zeros((SUBLANES, LANES), jnp.float32),
                             unroll=min(n_chunks, 8))

    if tail_valid_rows is None:
        # No partial block anywhere: mask-free hot path.
        out_ref[...] = run(False)
    else:
        i = pl.program_id(0)
        last = pl.num_programs(0) - 1

        @pl.when(i != last)
        def _bulk():
            out_ref[...] = run(False)

        @pl.when(i == last)
        def _tail():
            out_ref[...] = run(True)


def _physical_vmem_bytes():
    try:
        return int(pltpu.get_tpu_info().vmem_capacity_bytes)
    except Exception:
        return 64 << 20  # conservative (v7x per-TC physical VMEM)


def _choose_tiling(rows, br_cap):
    """Pick (block_rows, chunk_rows); chunk divides block, both multiples of 16."""
    br_cap = max(16, _round_up(br_cap, 16))
    chunk_cap = CHUNK_ROWS if br_cap >= CHUNK_ROWS else br_cap
    if br_cap >= CHUNK_ROWS:
        br_cap = (br_cap // CHUNK_ROWS) * CHUNK_ROWS
    if rows >= 2 * br_cap:
        return br_cap, chunk_cap
    # Fewer than two cap-sized blocks: target ~half the rows per step so the
    # "parallel" grid axis has >=2 steps for v7x megacore when there is enough
    # work to split (no-op on single-TC v5e/v6e).
    target = _round_up(max(1, -(-rows // 2)), 16)
    if target <= chunk_cap:
        return target, target
    return min(_round_up(target, chunk_cap), br_cap), chunk_cap


def _pick_block_cap():
    phys = _physical_vmem_bytes()
    # Keep the double-buffered f32 input pipeline (2 inputs x 2 buffers x
    # rows x 128 x 4 B) under ~1/4 of physical VMEM; cap at 8192 rows.
    cap = (phys // 4) // (2 * 2 * LANES * 4)
    cap = (cap // CHUNK_ROWS) * CHUNK_ROWS
    return int(max(CHUNK_ROWS, min(MAX_BLOCK_ROWS, cap)))


def focal_loss_with_pos_weight(preds, targets, *, pos_weight=1.0, alpha=0.25,
                               gamma=2.0, block_rows=None):
    p = preds.reshape(-1)
    t = targets.reshape(-1)
    n = int(p.shape[0])

    rows = n // LANES
    rem = n - rows * LANES

    total = jnp.float32(0.0)

    # Lane remainder (<128 elements): tiny plain-jnp epilogue instead of a
    # full-array jnp.pad copy (which would ~2x HBM traffic for this
    # bandwidth-bound op).
    if rem:
        pr = p[rows * LANES:].astype(jnp.float32)
        tr = t[rows * LANES:].astype(jnp.float32)
        total = total + jnp.sum(_focal_terms(pr, tr, pos_weight, gamma))

    if rows > 0:
        p2 = p[:rows * LANES].reshape(rows, LANES)
        t2 = t[:rows * LANES].reshape(rows, LANES)

        br_cap = _pick_block_cap() if block_rows is None else int(block_rows)
        br, chunk = _choose_tiling(rows, br_cap)
        num_steps = -(-rows // br)
        covered = num_steps * br
        tail_valid_rows = (None if covered == rows
                           else rows - (num_steps - 1) * br)

        # Explicit scoped-VMEM limit: actual pipeline footprint + headroom for
        # the chunk temporaries / Mosaic scratch, clamped vs physical VMEM
        # (64 MiB per TC on v7x).  Raises v5e's 16 MiB default when needed.
        phys = _physical_vmem_bytes()
        in_buf_bytes = 2 * br * LANES * (p2.dtype.itemsize + t2.dtype.itemsize)
        vmem_limit = in_buf_bytes + (12 << 20)
        vmem_limit = int(min(vmem_limit,
                             max((phys * 3) // 4, in_buf_bytes + (8 << 20))))

        kernel = functools.partial(
            _focal_loss_kernel,
            pos_weight=float(pos_weight), gamma=float(gamma),
            chunk_rows=chunk, tail_valid_rows=tail_valid_rows)

        # TODO(synk): sweep pipeline_mode=pl.Buffered(3) on the input specs for
        # v7x if an xprof trace shows exposed DMA at step boundaries.
        partials = pl.pallas_call(
            kernel,
            out_shape=jax.ShapeDtypeStruct((SUBLANES, num_steps * LANES),
                                           jnp.float32),
            grid_spec=pltpu.PrefetchScalarGridSpec(
                num_scalar_prefetch=0,
                grid=(num_steps,),
                in_specs=[
                    pl.BlockSpec((br, LANES), lambda i: (i, 0)),
                    pl.BlockSpec((br, LANES), lambda i: (i, 0)),
                ],
                out_specs=pl.BlockSpec((SUBLANES, LANES), lambda i: (0, i)),
            ),
            compiler_params=pltpu.CompilerParams(
                # Steps are independent -> megacore shards them on v7x;
                # no-op on single-TC v5e/v6e.
                dimension_semantics=("parallel",),
                vmem_limit_bytes=vmem_limit),
        )(p2, t2)

        total = total + jnp.sum(partials)

    # alpha hoisted out of the per-element path; mean over all n elements.
    return total * jnp.float32(alpha / n)


def _reference(preds, targets, pos_weight=1.0, alpha=0.25, gamma=2.0):
    # Mirrors the PyTorch module (eps-guarded BCE form).
    p = preds.reshape(-1).astype(jnp.float32)
    t = targets.reshape(-1).astype(jnp.float32)
    probas = jax.nn.sigmoid(p)
    bce_pos = -pos_weight * t * jnp.log(probas + 1e-08)
    bce_neg = -(1.0 - t) * jnp.log(1.0 - probas + 1e-08)
    bce = bce_pos + bce_neg
    pt = jnp.exp(-bce)
    focal = alpha * (1.0 - pt) ** gamma * bce
    return jnp.mean(focal)


if __name__ == "__main__":
    key = jax.random.PRNGKey(0)
    k_p, k_t, k_p2, k_t2 = jax.random.split(key, 4)

    # FocalLossWithPosWeight has no learned parameters; fixed hyper-params:
    pos_weight, alpha, gamma = 2.0, 0.25, 2.0

    loss_fn = jax.jit(functools.partial(
        focal_loss_with_pos_weight,
        pos_weight=pos_weight, alpha=alpha, gamma=gamma))

    # Lane-aligned case (2*4*16*16 = 2048 elements).
    preds = jax.random.normal(k_p, (2, 4, 16, 16), dtype=jnp.float32)
    targets = jax.random.bernoulli(k_t, p=0.3, shape=(2, 4, 16, 16)).astype(
        jnp.float32)
    loss = jax.block_until_ready(loss_fn(preds, targets))
    ref = _reference(preds, targets, pos_weight, alpha, gamma)
    assert jnp.allclose(loss, ref, rtol=1e-4, atol=1e-5), (loss, ref)

    # Non-lane-aligned case (3*5*7*11 = 1155): exercises the masked tail block
    # and the wrapper-side lane-remainder path.
    preds2 = jax.random.normal(k_p2, (3, 5, 7, 11), dtype=jnp.float32)
    targets2 = jax.random.bernoulli(k_t2, p=0.3, shape=(3, 5, 7, 11)).astype(
        jnp.float32)
    loss2 = jax.block_until_ready(loss_fn(preds2, targets2))
    ref2 = _reference(preds2, targets2, pos_weight, alpha, gamma)
    assert jnp.allclose(loss2, ref2, rtol=1e-4, atol=1e-5), (loss2, ref2)

    print("KERNEL_OK")
</pallas_src>

<mosaic_0001>
module attributes {stable_mosaic.version = 11 : i64} {
  func.func @_focal_loss_kernel(%arg0: i32, %arg1: memref<16x128xf32, #tpu.memory_space<vmem>>, %arg2: memref<16x128xf32, #tpu.memory_space<vmem>>, %arg3: memref<8x128xf32, #tpu.memory_space<vmem>>) attributes {dimension_semantics = [#tpu.dimension_semantics<parallel>], iteration_bounds = array<i64: 1>, scalar_prefetch = 0 : i64, scratch_operands = 0 : i64, tpu.core_type = #tpu.core_type<tc>, window_params = [{transform_indices = @transform_0, window_bounds = array<i64: 16, 128>}, {transform_indices = @transform_1, window_bounds = array<i64: 16, 128>}, {transform_indices = @transform_2, window_bounds = array<i64: 8, 128>}]} {
    %cst = arith.constant 0.000000e+00 : f32
    %0 = vector.broadcast %cst : f32 to vector<8x128xf32>
    %c0_i32 = arith.constant 0 : i32
    %c16_i32 = arith.constant 16 : i32
    %1 = arith.muli %c0_i32, %c16_i32 : i32
    %2 = tpu.assume_multiple %1, 16 : i32
    %3 = arith.index_cast %2 : i32 to index
    %c0 = arith.constant 0 : index
    %4 = vector.load %arg1[%3, %c0] : memref<16x128xf32, #tpu.memory_space<vmem>>, vector<16x128xf32>
    %5 = arith.index_cast %2 : i32 to index
    %c0_0 = arith.constant 0 : index
    %6 = vector.load %arg2[%5, %c0_0] : memref<16x128xf32, #tpu.memory_space<vmem>>, vector<16x128xf32>
    %cst_1 = arith.constant 0.000000e+00 : f32
    %7 = vector.broadcast %cst_1 : f32 to vector<16x128xf32>
    %8 = arith.maximumf %4, %7 : vector<16x128xf32>
    %9 = math.absf %4 : vector<16x128xf32>
    %cst_2 = arith.constant 0.000000e+00 : f32
    %10 = vector.broadcast %cst_2 : f32 to vector<16x128xf32>
    %11 = arith.subf %10, %9 : vector<16x128xf32>
    %12 = math.exp %11 : vector<16x128xf32>
    %cst_3 = arith.constant 1.000000e+00 : f32
    %13 = vector.broadcast %cst_3 : f32 to vector<16x128xf32>
    %14 = arith.addf %13, %12 : vector<16x128xf32>
    %15 = math.log %14 : vector<16x128xf32>
    %16 = arith.addf %8, %15 : vector<16x128xf32>
    %cst_4 = arith.constant 2.000000e+00 : f32
    %17 = vector.broadcast %cst_4 : f32 to vector<16x128xf32>
    %18 = arith.mulf %17, %6 : vector<16x128xf32>
    %19 = arith.subf %16, %4 : vector<16x128xf32>
    %cst_5 = arith.constant 18.420681 : f32
    %20 = vector.broadcast %cst_5 : f32 to vector<16x128xf32>
    %21 = arith.minimumf %19, %20 : vector<16x128xf32>
    %22 = arith.mulf %18, %21 : vector<16x128xf32>
    %cst_6 = arith.constant 1.000000e+00 : f32
    %23 = vector.broadcast %cst_6 : f32 to vector<16x128xf32>
    %24 = arith.subf %23, %6 : vector<16x128xf32>
    %cst_7 = arith.constant 18.420681 : f32
    %25 = vector.broadcast %cst_7 : f32 to vector<16x128xf32>
    %26 = arith.minimumf %16, %25 : vector<16x128xf32>
    %27 = arith.mulf %24, %26 : vector<16x128xf32>
    %28 = arith.addf %22, %27 : vector<16x128xf32>
    %cst_8 = arith.constant 0.000000e+00 : f32
    %29 = vector.broadcast %cst_8 : f32 to vector<16x128xf32>
    %30 = arith.subf %29, %28 : vector<16x128xf32>
    %31 = math.exp %30 : vector<16x128xf32>
    %cst_9 = arith.constant 1.000000e+00 : f32
    %32 = vector.broadcast %cst_9 : f32 to vector<16x128xf32>
    %33 = arith.subf %32, %31 : vector<16x128xf32>
    %34 = arith.mulf %33, %33 : vector<16x128xf32>
    %35 = arith.mulf %34, %28 : vector<16x128xf32>
    %36 = vector.shape_cast %35 : vector<16x128xf32> to vector<2x8x128xf32>
    %cst_10 = arith.constant dense<0.000000e+00> : vector<8x128xf32>
    %37 = vector.multi_reduction <add>, %36, %cst_10 [0] : vector<2x8x128xf32> to vector<8x128xf32>
    %38 = arith.addf %0, %37 : vector<8x128xf32>
    %c1_i32 = arith.constant 1 : i32
    %c0_11 = arith.constant 0 : index
    %c0_12 = arith.constant 0 : index
    %39 = vector.load %arg3[%c0_11, %c0_12] : memref<8x128xf32, #tpu.memory_space<vmem>>, vector<8x128xf32>
    tpu.vector_store %arg3[%c0_11, %c0_12], %38 {strides = array<i32>} : memref<8x128xf32, #tpu.memory_space<vmem>>, vector<8x128xf32>,
    return
  }
  func.func @transform_0(%arg0: i32) -> (i32, i32) {
    %c0_i32 = arith.constant 0 : i32
    %c0_i32_0 = arith.constant 0 : i32
    return %arg0, %c0_i32 : i32, i32
  }
  func.func @transform_1(%arg0: i32) -> (i32, i32) {
    %c0_i32 = arith.constant 0 : i32
    %c0_i32_0 = arith.constant 0 : i32
    return %arg0, %c0_i32 : i32, i32
  }
  func.func @transform_2(%arg0: i32) -> (i32, i32) {
    %c0_i32 = arith.constant 0 : i32
    %c0_i32_0 = arith.constant 0 : i32
    return %c0_i32, %arg0 : i32, i32
  }
}

</mosaic_0001>

<bundles_post_ra>
// kernel: focal_loss_with_pos_weight.1
= control target key start
LH: loop header
LB: loop body
LE: loop exit
PB: predicated region body
PF: predicated region fallthrough
CT: control target
= control target key end

     0   :  { %s110_s0 = inlined_call_operand.vmem [shape: f32[16,128], index: 0, kind: input, shape index: {}]   ;;  %s111_s1 = inlined_call_operand.vmem [shape: f32[16,128], index: 1, kind: input, shape index: {}]   ;;  %s112_s2 = inlined_call_operand.vmem [shape: f32[8,128], index: 2, kind: output, shape index: {}]  }
   0x1   :  { %v11_v0 = vld [vmem:[%s110_s0] sm:$0xff]  ;;  %v12_v1 = vld [vmem:[%s110_s0 + $0x8] sm:$0xff] }
   0x2   :  { %v17_v2 = vand.u32 2147483647, %v11_v0  ;;  %v18_v3 = vand.u32 2147483647, %v12_v1  ;;  %v15_v12 = vmax.f32 %v11_v0, 0.0  ;;  %v13_v14 = vld [vmem:[%s111_s1] sm:$0xff] }
   0x3   :  { %v16_v15 = vmax.f32 %v12_v1, 0.0  ;;  %v14_v17 = vld [vmem:[%s111_s1 + $0x8] sm:$0xff]  ;;  %v41_v21 = vsub.f32 1.0, %v13_v14  ;;  %v33_v24 = vmul.f32 2.0, %v13_v14 }
   0x4   :  { %v19_v4 = vsub.f32 0.0, %v17_v2  ;;  %v20_v5 = vsub.f32 0.0, %v18_v3  ;;  %v42_v23 = vsub.f32 1.0, %v14_v17  ;;  %v34_v27 = vmul.f32 2.0, %v14_v17 }
   0x6   :  { %v21_v6 = vmul.f32 1.442695, %v19_v4  ;;  %v23_v7 = vmul.f32 1.442695, %v20_v5 }
   0x8   :  { %68 = vpow2.f32 %v21_v6 }
   0x9   :  { %70 = vpow2.f32 %v23_v7 }
  0x12   :  { %v69_v8 = vpop.eup %68 }
  0x13   :  { %v71_v9 = vpop.eup %70  ;;  %v25_v10 = vadd.f32 1.0, %v69_v8 }
  0x14   :  { %v26_v11 = vadd.f32 1.0, %v71_v9 }
  0x15   :  { %72 = vlog2.f32 %v25_v10 }
  0x16   :  { %74 = vlog2.f32 %v26_v11 }
  0x1f   :  { %v73_v13 = vpop.eup %72 }
  0x20   :  { %v75_v16 = vpop.eup %74  ;;  %v28_v18 = vmul.f32 0.6931472, %v73_v13 }
  0x21   :  { %v30_v19 = vmul.f32 0.6931472, %v75_v16 }
  0x22   :  { %v31_v20 = vadd.f32 %v28_v18, %v15_v12 }
  0x23   :  { %v32_v22 = vadd.f32 %v30_v19, %v16_v15 }
  0x24   :  { %v35_v25 = vsub.f32 %v31_v20, %v11_v0  ;;  %v43_v26 = vmin.f32 %v31_v20, 18.420681 }
  0x25   :  { %v36_v28 = vsub.f32 %v32_v22, %v12_v1  ;;  %v44_v29 = vmin.f32 %v32_v22, 18.420681 }
  0x26   :  { %v37_v30 = vmin.f32 %v35_v25, 18.420681  ;;  %v45_v31 = vmul.f32 %v43_v26, %v41_v21 }
  0x27   :  { %v38_v32 = vmin.f32 %v36_v28, 18.420681  ;;  %v46_v33 = vmul.f32 %v44_v29, %v42_v23 }
  0x28   :  { %v39_v34 = vmul.f32 %v37_v30, %v33_v24 }
  0x29   :  { %v40_v35 = vmul.f32 %v38_v32, %v34_v27 }
  0x2a   :  { %v47_v36 = vadd.f32 %v45_v31, %v39_v34 }
  0x2b   :  { %v48_v37 = vadd.f32 %v46_v33, %v40_v35 }
  0x2c   :  { %v49_v38 = vsub.f32 0.0, %v47_v36 }
  0x2d   :  { %v50_v39 = vsub.f32 0.0, %v48_v37 }
  0x2e   :  { %v51_v40 = vmul.f32 1.442695, %v49_v38 }
  0x2f   :  { %v53_v41 = vmul.f32 1.442695, %v50_v39 }
  0x30   :  { %76 = vpow2.f32 %v51_v40 }
  0x31   :  { %78 = vpow2.f32 %v53_v41 }
  0x3a   :  { %v77_v42 = vpop.eup %76 }
  0x3b   :  { %v79_v43 = vpop.eup %78  ;;  %v55_v44 = vsub.f32 1.0, %v77_v42 }
  0x3c   :  { %v56_v45 = vsub.f32 1.0, %v79_v43 }
  0x3d   :  { %v57_v46 = vmul.f32 %v55_v44, %v55_v44 }
  0x3e   :  { %v58_v47 = vmul.f32 %v56_v45, %v56_v45 }
  0x3f   :  { %v59_v48 = vmul.f32 %v57_v46, %v47_v36 }
  0x40   :  { %v60_v49 = vmul.f32 %v58_v47, %v48_v37 }
  0x42   :  { %v61_v50 = vadd.f32 %v60_v49, %v59_v48 }
  0x44   :  { %63 = vst [vmem:[%s112_s2] sm:$0xff] %v61_v50 }

</bundles_post_ra>
